<compile_context>
chip_gen: v5e
topology: v5e:2x2
jax: 0.10.0
libtpu: 0.0.40
codegen_flags: <defaults>
</compile_context>

<pallas_src>
import functools

import jax
import jax.numpy as jnp
from jax.experimental import pallas as pl
from jax.experimental.pallas import tpu as pltpu

LANE = 128
XL_RESIDENT_BYTES = 8 << 20   # keep xl VMEM-resident up to 8 MiB (v7x-safe budget)


def _round_up(v, m):
    return (v + m - 1) // m * m


def _choose_tiles(n):
    """Pick (n_pad, tm, tk): row tile tm and reduction tile tk, both dividing n_pad."""
    n_pad = _round_up(max(n, LANE), LANE)
    if n_pad >= 8192:
        tm, tk = 2048, 1024
    elif n_pad >= 2048:
        tm, tk = 1024, 512
    elif n_pad >= 1024:
        tm, tk = 512, 512
    else:
        tm = tk = n_pad            # small graph: single tile, single grid step
    n_pad = _round_up(n_pad, max(tm, tk))
    return n_pad, tm, tk


def _pad2(a, rows, cols):
    return jnp.pad(a, ((0, rows - a.shape[0]), (0, cols - a.shape[1])))


# ----------------------------------------------------------------------------
# Kernel 1: per-row-tile neighbor-feature transform   xl = x @ Wl   (bf16 out)
# ----------------------------------------------------------------------------
def transform_kernel(x_ref, wl_ref, xl_ref):
    xl_ref[...] = jnp.dot(x_ref[...], wl_ref[...],
                          preferred_element_type=jnp.float32).astype(xl_ref.dtype)


def feature_transform(x, wl, *, tm):
    n_pad, f_in = x.shape
    f_out = wl.shape[1]
    vmem_need = 2 * tm * f_in * 2 + f_in * f_out * 2 + 2 * tm * f_out * 2
    vmem_limit = int(min(max(2 * vmem_need, 32 << 20), 48 << 20))
    return pl.pallas_call(
        transform_kernel,
        out_shape=jax.ShapeDtypeStruct((n_pad, f_out), jnp.bfloat16),
        grid_spec=pltpu.PrefetchScalarGridSpec(
            num_scalar_prefetch=0,
            grid=(n_pad // tm,),
            in_specs=[
                pl.BlockSpec((tm, f_in), lambda i: (i, 0)),
                pl.BlockSpec((f_in, f_out), lambda i: (0, 0)),
            ],
            out_specs=pl.BlockSpec((tm, f_out), lambda i: (i, 0)),
        ),
        compiler_params=pltpu.CompilerParams(
            dimension_semantics=("parallel",),
            vmem_limit_bytes=vmem_limit),
    )(x, wl)


# ----------------------------------------------------------------------------
# Kernel 2: tiled mean-aggregation + fused self term + fused activation
#   out[i] = act( deg_inv[i] * sum_k adj[i, k] @ xl[k]  +  x[i] @ Wr + b )
# ----------------------------------------------------------------------------
def aggregate_kernel(adj_ref, xl_ref, x_ref, wr_ref, b_ref, dinv_ref,
                     out_ref, acc_ref,
                     *, activation, valid_cols, tk, xl_resident):
    k = pl.program_id(1)

    @pl.when(k == 0)
    def _():
        acc_ref[...] = jnp.zeros_like(acc_ref)

    # int8 0/1 adjacency -> bf16 on the VPU (hidden under DMA slack), then MXU dot.
    adj = adj_ref[...].astype(jnp.bfloat16)
    if xl_resident:
        start = pl.multiple_of(k * tk, tk)
        xl = xl_ref[pl.ds(start, tk), :]
    else:
        xl = xl_ref[...]
    acc_ref[...] += jnp.dot(adj, xl, preferred_element_type=jnp.float32)

    @pl.when(k == pl.num_programs(1) - 1)
    def _():
        # Fused self term: x @ Wr + b (MXU has slack at finalize; saves the f32 xs
        # HBM round trip of the previous version).
        xs = jnp.dot(x_ref[...], wr_ref[...],
                     preferred_element_type=jnp.float32) + b_ref[...]
        o = acc_ref[...] * dinv_ref[...] + xs
        if activation == "relu":
            out_ref[...] = jnp.maximum(o, 0.0).astype(out_ref.dtype)
        else:  # log_softmax over classes; mask padded class columns to -inf
            col = jax.lax.broadcasted_iota(jnp.int32, o.shape, 1)
            o = jnp.where(col < valid_cols, o, -jnp.inf)
            m = jnp.max(o, axis=1, keepdims=True)
            z = o - m
            lse = jnp.log(jnp.sum(jnp.exp(z), axis=1, keepdims=True))
            out_ref[...] = (z - lse).astype(out_ref.dtype)


def sage_layer(adj, dinv, x, wl, wr, b, *, tm, tk, activation, valid_cols,
               out_dtype):
    n_pad = adj.shape[0]
    f_in = x.shape[1]
    f_out = wl.shape[1]

    xl = feature_transform(x, wl, tm=tm)                       # (n_pad, f_out) bf16
    xl_resident = (n_pad * f_out * 2) <= XL_RESIDENT_BYTES

    kern = functools.partial(aggregate_kernel, activation=activation,
                             valid_cols=valid_cols, tk=tk,
                             xl_resident=xl_resident)

    out_itemsize = jnp.dtype(out_dtype).itemsize
    xl_hbm_reads = 1 if xl_resident else (n_pad // tm)
    cost = pl.CostEstimate(
        flops=int(2 * n_pad * n_pad * f_out + 2 * n_pad * f_in * f_out),
        transcendentals=int(n_pad * f_out) if activation == "log_softmax" else 0,
        bytes_accessed=int(
            adj.size * adj.dtype.itemsize
            + xl_hbm_reads * xl.size * xl.dtype.itemsize
            + x.size * x.dtype.itemsize
            + wr.size * wr.dtype.itemsize
            + b.size * b.dtype.itemsize
            + dinv.size * dinv.dtype.itemsize
            + n_pad * f_out * out_itemsize),
    )

    if xl_resident:
        xl_spec = pl.BlockSpec((n_pad, f_out), lambda i, k: (0, 0))   # resident
    else:
        xl_spec = pl.BlockSpec((tk, f_out), lambda i, k: (k, 0))      # k-tiled

    # Explicit VMEM budget (2x headroom), floored at 32 MiB (above v5e's 16 MiB
    # scoped default) and capped at 48 MiB (safe under v7x's 64 MiB physical).
    vmem_need = (2 * tm * tk * 1
                 + (n_pad * f_out * 2 if xl_resident else 2 * tk * f_out * 2)
                 + 2 * tm * f_in * 2
                 + f_in * f_out * 2 + f_out * 4
                 + 2 * tm * 4
                 + tm * f_out * 4
                 + 2 * tm * f_out * out_itemsize)
    vmem_limit = int(min(max(2 * vmem_need, 32 << 20), 48 << 20))

    # TODO(synk): if profiling shows exposed DMA around finalize steps, bump the
    # adjacency spec to pipeline_mode=pl.Buffered(3).
    return pl.pallas_call(
        kern,
        out_shape=jax.ShapeDtypeStruct((n_pad, f_out), out_dtype),
        grid_spec=pltpu.PrefetchScalarGridSpec(
            num_scalar_prefetch=0,
            grid=(n_pad // tm, n_pad // tk),
            in_specs=[
                pl.BlockSpec((tm, tk), lambda i, k: (i, k)),        # adjacency (int8)
                xl_spec,                                            # neighbor feats
                pl.BlockSpec((tm, f_in), lambda i, k: (i, 0)),      # raw feats (self)
                pl.BlockSpec((f_in, f_out), lambda i, k: (0, 0)),   # Wr (resident)
                pl.BlockSpec((1, f_out), lambda i, k: (0, 0)),      # bias (resident)
                pl.BlockSpec((tm, 1), lambda i, k: (i, 0)),         # 1 / in-degree
            ],
            out_specs=pl.BlockSpec((tm, f_out), lambda i, k: (i, 0)),
            scratch_shapes=[pltpu.VMEM((tm, f_out), jnp.float32)],
        ),
        compiler_params=pltpu.CompilerParams(
            dimension_semantics=("parallel", "arbitrary"),
            vmem_limit_bytes=vmem_limit),
        cost_estimate=cost,
    )(adj, xl, x, wr, b, dinv)


# ----------------------------------------------------------------------------
# Graph preprocessing (cacheable across forward calls) + full forward
# ----------------------------------------------------------------------------
def build_graph_operands(edge_index, num_nodes, n_pad):
    """int8 adjacency (1 byte/elem, padded) + 1/in-degree column (f32, padded)."""
    # TODO(synk): for realistically sparse graphs, replace the dense adjacency with a
    # block-sparse path: scalar-prefetch per-row-tile lists of nonzero (i, k) blocks
    # (PrefetchScalarGridSpec) and skip empty reduction steps.
    src, dst = edge_index[0], edge_index[1]
    adj = jnp.zeros((num_nodes, num_nodes), jnp.float32).at[dst, src].add(1.0)
    deg = jnp.sum(adj, axis=1, keepdims=True)
    dinv = 1.0 / jnp.maximum(deg, 1.0)
    adj_p = _pad2(adj, n_pad, n_pad).astype(jnp.int8)
    dinv_p = jnp.pad(dinv, ((0, n_pad - num_nodes), (0, 0)), constant_values=1.0)
    return adj_p, dinv_p


def graphsage_forward(x, edge_index, params):
    n, in_c = x.shape
    hid_c = params["w1l"].shape[1]
    out_c = params["w2l"].shape[1]

    n_pad, tm, tk = _choose_tiles(n)
    in_p, hid_p, out_p = (_round_up(d, LANE) for d in (in_c, hid_c, out_c))

    adj_p, dinv_p = build_graph_operands(edge_index, n, n_pad)

    x_p = _pad2(x, n_pad, in_p).astype(jnp.bfloat16)
    w1l = _pad2(params["w1l"], in_p, hid_p).astype(jnp.bfloat16)
    w1r = _pad2(params["w1r"], in_p, hid_p).astype(jnp.bfloat16)
    b1 = _pad2(params["b1"], 1, hid_p).astype(jnp.float32)
    w2l = _pad2(params["w2l"], hid_p, out_p).astype(jnp.bfloat16)
    w2r = _pad2(params["w2r"], hid_p, out_p).astype(jnp.bfloat16)
    b2 = _pad2(params["b2"], 1, out_p).astype(jnp.float32)

    # dropout(training=False) == identity (eval/inference semantics).
    h = sage_layer(adj_p, dinv_p, x_p, w1l, w1r, b1, tm=tm, tk=tk,
                   activation="relu", valid_cols=hid_p, out_dtype=jnp.bfloat16)
    out = sage_layer(adj_p, dinv_p, h, w2l, w2r, b2, tm=tm, tk=tk,
                     activation="log_softmax", valid_cols=out_c,
                     out_dtype=jnp.float32)
    return out[:n, :out_c]


def init_params(key, in_c, hid_c, out_c):
    ks = jax.random.split(key, 4)

    def glorot(k, fan_in, fan_out):
        limit = jnp.sqrt(6.0 / (fan_in + fan_out))
        return jax.random.uniform(k, (fan_in, fan_out), jnp.float32, -limit, limit)

    return {
        "w1l": glorot(ks[0], in_c, hid_c),   # conv1 lin_l (neighbor aggregate)
        "w1r": glorot(ks[1], in_c, hid_c),   # conv1 lin_r (root)
        "b1": jnp.zeros((1, hid_c), jnp.float32),
        "w2l": glorot(ks[2], hid_c, out_c),
        "w2r": glorot(ks[3], hid_c, out_c),
        "b2": jnp.zeros((1, out_c), jnp.float32),
    }


if __name__ == "__main__":
    key = jax.random.PRNGKey(0)
    k_x, k_p = jax.random.split(key)

    # Small synthetic graph: 8 nodes, 16 input features, hid=64, 4 classes.
    N, IN_C, HID_C, OUT_C = 8, 16, 64, 4
    x = jax.random.normal(k_x, (N, IN_C), dtype=jnp.float32)

    src = jnp.array([0, 1, 2, 3, 4, 5, 6, 7, 1, 2, 3, 4, 5, 6, 7, 0, 0, 4, 2, 6],
                    dtype=jnp.int32)
    dst = jnp.array([1, 2, 3, 4, 5, 6, 7, 0, 0, 1, 2, 3, 4, 5, 6, 7, 4, 0, 6, 2],
                    dtype=jnp.int32)
    edge_index = jnp.stack([src, dst], axis=0)  # [2, E]

    params = init_params(k_p, IN_C, HID_C, OUT_C)

    out = jax.block_until_ready(graphsage_forward(x, edge_index, params))

    # Pure-JAX f32 reference (same math, un-tiled) for correctness.
    adj = jnp.zeros((N, N), jnp.float32).at[dst, src].add(1.0)
    dinv = 1.0 / jnp.maximum(jnp.sum(adj, axis=1, keepdims=True), 1.0)
    h_ref = jnp.maximum(
        (dinv * (adj @ x)) @ params["w1l"] + x @ params["w1r"] + params["b1"], 0.0)
    o_ref = ((dinv * (adj @ h_ref)) @ params["w2l"]
             + h_ref @ params["w2r"] + params["b2"])
    ref = jax.nn.log_softmax(o_ref, axis=1)

    assert out.shape == (N, OUT_C)
    row_sums = jnp.sum(jnp.exp(out), axis=1)
    assert jnp.allclose(row_sums, 1.0, atol=1e-4)
    # Documented bf16 (neighbor features / activations) tolerance vs f32 reference.
    assert float(jnp.max(jnp.abs(out - ref))) < 0.25

    print("KERNEL_OK")
</pallas_src>

<mosaic_0001>
module attributes {stable_mosaic.version = 11 : i64} {
  func.func @transform_kernel(%arg0: i32, %arg1: memref<128x128xbf16, #tpu.memory_space<vmem>>, %arg2: memref<128x128xbf16, #tpu.memory_space<vmem>>, %arg3: memref<128x128xbf16, #tpu.memory_space<vmem>>) attributes {dimension_semantics = [#tpu.dimension_semantics<parallel>], iteration_bounds = array<i64: 1>, scalar_prefetch = 0 : i64, scratch_operands = 0 : i64, tpu.core_type = #tpu.core_type<tc>, window_params = [{transform_indices = @transform_0, window_bounds = array<i64: 128, 128>}, {pipeline_mode = #tpu.pipeline_mode<synchronous>, transform_indices = @transform_1, window_bounds = array<i64: 128, 128>}, {transform_indices = @transform_2, window_bounds = array<i64: 128, 128>}]} {
    %c0 = arith.constant 0 : index
    %c0_0 = arith.constant 0 : index
    %0 = vector.load %arg1[%c0, %c0_0] : memref<128x128xbf16, #tpu.memory_space<vmem>>, vector<128x128xbf16>
    %c0_1 = arith.constant 0 : index
    %c0_2 = arith.constant 0 : index
    %1 = vector.load %arg2[%c0_1, %c0_2] : memref<128x128xbf16, #tpu.memory_space<vmem>>, vector<128x128xbf16>
    %cst = arith.constant dense<0.000000e+00> : vector<128x128xf32>
    %2 = tpu.matmul %0, %1, %cst {dimension_numbers = #tpu.dot_dimension_numbers<[1], [0], [0], [1], [0, 0, 1, 1], [], []>} : vector<128x128xbf16>, vector<128x128xbf16>, vector<128x128xf32> -> vector<128x128xf32>
    %3 = arith.truncf %2 : vector<128x128xf32> to vector<128x128xbf16>
    %c0_3 = arith.constant 0 : index
    %c0_4 = arith.constant 0 : index
    %4 = vector.load %arg3[%c0_3, %c0_4] : memref<128x128xbf16, #tpu.memory_space<vmem>>, vector<128x128xbf16>
    tpu.vector_store %arg3[%c0_3, %c0_4], %3 {strides = array<i32>} : memref<128x128xbf16, #tpu.memory_space<vmem>>, vector<128x128xbf16>,
    return
  }
  func.func @transform_0(%arg0: i32) -> (i32, i32) {
    %c0_i32 = arith.constant 0 : i32
    %c0_i32_0 = arith.constant 0 : i32
    return %arg0, %c0_i32 : i32, i32
  }
  func.func @transform_1(%arg0: i32) -> (i32, i32) {
    %c0_i32 = arith.constant 0 : i32
    %c0_i32_0 = arith.constant 0 : i32
    %c0_i32_1 = arith.constant 0 : i32
    return %c0_i32, %c0_i32_0 : i32, i32
  }
  func.func @transform_2(%arg0: i32) -> (i32, i32) {
    %c0_i32 = arith.constant 0 : i32
    %c0_i32_0 = arith.constant 0 : i32
    return %arg0, %c0_i32 : i32, i32
  }
}

</mosaic_0001>

<bundles_post_ra>
// kernel: tpu_custom_call.1
= control target key start
LH: loop header
LB: loop body
LE: loop exit
PB: predicated region body
PF: predicated region fallthrough
CT: control target
= control target key end

     0   :  { %7 = vsyncpa [#allocation3], 0  ;;  %s545_s0 = inlined_call_operand.hbm [shape: bf16[128,128], index: 0, kind: input, shape index: {}]   ;;  %s546_s1 = inlined_call_operand.hbm [shape: bf16[128,128], index: 1, kind: input, shape index: {}]   ;;  %s547_s2 = inlined_call_operand.hbm [shape: bf16[128,128], index: 2, kind: output, shape index: {}]  }
   0x1   :  { %8 = vsyncpa [#allocation6], 0 }
   0x2   :  { %9 = vsyncpa [#allocation4], 0  ;;  %s14_s11 = sshll.u32 %s545_s0, 4  ;;  %s507_s12 = smov [#allocation2]   ;;  %s15_s11 = int_to_ptr.hbm [resolvable:$true] %s14_s11 }
   0x3   :  { %s16_s13 = sshll.u32 %s507_s12, 4  ;;  %s27_s16 = sshll.u32 %s546_s1, 4  ;;  %s17_s13 = int_to_ptr.vmem [resolvable:$true] %s16_s13  ;;  %s28_s16 = int_to_ptr.hbm [resolvable:$true] %s27_s16 }
   0x4   :  { %s508_s17 = smov 64   ;;  %s509_s18 = smov 4  }
   0x5   :  { %22 = dma.hbm_to_vmem [thread:$0]  %s15_s11, 1024, %s17_s13, [#allocation3], %s508_s17, %s508_s17, %s509_s18  }
   0x6   :  { %s510_s19 = smov [#allocation5]  }
   0x7   :  { %s29_s20 = sshll.u32 %s510_s19, 4  ;;  %s30_s20 = int_to_ptr.vmem [resolvable:$true] %s29_s20 }
   0x8   :  { %35 = dma.hbm_to_vmem [thread:$0]  %s28_s16, 1024, %s30_s20, [#allocation6], %s508_s17, %s508_s17, %s509_s18  }
   0x9   :  { %501 = dma.done.wait [#allocation3], 1024  }
   0xa   :  { %502 = vsyncadd [#allocation3], 4294966272 }
   0xb   :  { %503 = dma.done.wait [#allocation6], 1024  }
   0xc   :  { %504 = vsyncadd [#allocation6], 4294966272  ;;  %v352_v0 = vld [vmem:[#allocation5 + $0x38] sm:$0xff]  ;;  %v351_v1 = vld [vmem:[#allocation5 + $0x30] sm:$0xff]  ;;  %s511_s0 = smov [#allocation7]   ;;  %s259_s23 = sshll.u32 %s547_s2, 4  ;;  %s260_s23 = int_to_ptr.hbm [resolvable:$true] %s259_s23 }
   0xd   :  { %172 = vmatpush.bf16.msra.mxu0 %v352_v0  ;;  %400 = vmatpush.bf16.msra.mxu1 %v352_v0  ;;  %v350_v2 = vld [vmem:[#allocation5 + $0x28] sm:$0xff]  ;;  %v349_v3 = vld [vmem:[#allocation5 + $0x20] sm:$0xff]  ;;  %v348_v4 = vld [vmem:[#allocation5 + $0x18] sm:$0xff]  ;;  %s257_s1 = sshll.u32 %s511_s0, 4  ;;  %s258_s1 = int_to_ptr.vmem [resolvable:$true] %s257_s1 }
   0xe   :  { %401 = vmatpush.bf16.msra.mxu2 %v352_v0  ;;  %402 = vmatpush.bf16.msra.mxu3 %v352_v0  ;;  %v347_v5 = vld [vmem:[#allocation5 + $0x10] sm:$0xff]  ;;  %v346_v6 = vld [vmem:[#allocation5 + $0x8] sm:$0xff]  ;;  %v345_v7 = vld [vmem:[#allocation5] sm:$0xff] }
   0xf   :  { %v337_v8 = vld [vmem:[#allocation2] sm:$0xff]  ;;  %v339_v9 = vld [vmem:[#allocation2 + $0x10] sm:$0xff]  ;;  %v338_v12 = vld [vmem:[#allocation2 + $0x8] sm:$0xff] }
  0x10   :  { %v341_v10 = vld [vmem:[#allocation2 + $0x20] sm:$0xff]  ;;  %v343_v11 = vld [vmem:[#allocation2 + $0x30] sm:$0xff]  ;;  %v340_v13 = vld [vmem:[#allocation2 + $0x18] sm:$0xff] }
  0x11   :  { %173 = vmatpush.bf16.msra.mxu0 %v351_v1  ;;  %403 = vmatpush.bf16.msra.mxu1 %v351_v1  ;;  %v342_v14 = vld [vmem:[#allocation2 + $0x28] sm:$0xff]  ;;  %v344_v15 = vld [vmem:[#allocation2 + $0x38] sm:$0xff] }
  0x12   :  { %404 = vmatpush.bf16.msra.mxu2 %v351_v1  ;;  %405 = vmatpush.bf16.msra.mxu3 %v351_v1 }
  0x15   :  { %174 = vmatpush.bf16.msra.mxu0 %v350_v2  ;;  %406 = vmatpush.bf16.msra.mxu1 %v350_v2 }
  0x16   :  { %407 = vmatpush.bf16.msra.mxu2 %v350_v2  ;;  %408 = vmatpush.bf16.msra.mxu3 %v350_v2 }
  0x19   :  { %175 = vmatpush.bf16.msra.mxu0 %v349_v3  ;;  %409 = vmatpush.bf16.msra.mxu1 %v349_v3 }
  0x1a   :  { %410 = vmatpush.bf16.msra.mxu2 %v349_v3  ;;  %411 = vmatpush.bf16.msra.mxu3 %v349_v3 }
  0x1d   :  { %176 = vmatpush.bf16.msra.mxu0 %v348_v4  ;;  %412 = vmatpush.bf16.msra.mxu1 %v348_v4 }
  0x1e   :  { %413 = vmatpush.bf16.msra.mxu2 %v348_v4  ;;  %414 = vmatpush.bf16.msra.mxu3 %v348_v4 }
  0x21   :  { %177 = vmatpush.bf16.msra.mxu0 %v347_v5  ;;  %415 = vmatpush.bf16.msra.mxu1 %v347_v5 }
  0x22   :  { %416 = vmatpush.bf16.msra.mxu2 %v347_v5  ;;  %417 = vmatpush.bf16.msra.mxu3 %v347_v5 }
  0x25   :  { %178 = vmatpush.bf16.msra.mxu0 %v346_v6  ;;  %418 = vmatpush.bf16.msra.mxu1 %v346_v6 }
  0x26   :  { %419 = vmatpush.bf16.msra.mxu2 %v346_v6  ;;  %420 = vmatpush.bf16.msra.mxu3 %v346_v6 }
  0x29   :  { %179 = vmatpush.bf16.msra.mxu0 %v345_v7  ;;  %421 = vmatpush.bf16.msra.mxu1 %v345_v7 }
  0x2a   :  { %422 = vmatpush.bf16.msra.mxu2 %v345_v7  ;;  %423 = vmatpush.bf16.msra.mxu3 %v345_v7 }
  0x2c   :  { %180 = vmatmul.bf16.vlgmr.msra.gmra.mxu0 %v337_v8  ;;  %190 = vmatmul.bf16.vlgmr.msra.gmra.mxu1 %v339_v9 }
  0x2d   :  { %200 = vmatmul.bf16.vlgmr.msra.gmra.mxu2 %v341_v10  ;;  %210 = vmatmul.bf16.vlgmr.msra.gmra.mxu3 %v343_v11 }
  0x3c   :  { %185 = vmatmul.bf16.gmra.mxu0 %v338_v12  ;;  %195 = vmatmul.bf16.gmra.mxu1 %v340_v13 }
  0x3d   :  { %205 = vmatmul.bf16.gmra.mxu2 %v342_v14  ;;  %215 = vmatmul.bf16.gmra.mxu3 %v344_v15 }
  0xa9   :  { %v181_v16 = vpop.f32.mrf.mxu0  ;;  %v191_v17 = vpop.f32.mrf.mxu1 }
  0xb0   :  { %v201_v18 = vpop.f32.mrf.mxu2  ;;  %v211_v19 = vpop.f32.mrf.mxu3 }
  0xb1   :  { %v183_v20 = vpop.f32.mrf.mxu0  ;;  %v193_v21 = vpop.f32.mrf.mxu1 }
  0xb2   :  { %v356_v22 = vpack.c.bf16 %v183_v20, %v181_v16  ;;  %v366_v23 = vpack.c.bf16 %v193_v21, %v191_v17 }
  0xb4   :  { %357 = vst [vmem:[#allocation7] sm:$0xff] %v356_v22  }
  0xb5   :  { %394 = vst [vmem:[#allocation7 + $0x10] sm:$0xff] %v366_v23  }
  0xb8   :  { %v203_v24 = vpop.f32.mrf.mxu2  ;;  %v213_v25 = vpop.f32.mrf.mxu3 }
  0xb9   :  { %v376_v26 = vpack.c.bf16 %v203_v24, %v201_v18  ;;  %v386_v27 = vpack.c.bf16 %v213_v25, %v211_v19  ;;  %v186_v28 = vpop.f32.mrf.mxu0  ;;  %v196_v29 = vpop.f32.mrf.mxu1 }
  0xbb   :  { %396 = vst [vmem:[#allocation7 + $0x20] sm:$0xff] %v376_v26  }
  0xbc   :  { %398 = vst [vmem:[#allocation7 + $0x30] sm:$0xff] %v386_v27  }
  0xc0   :  { %v206_v30 = vpop.f32.mrf.mxu2  ;;  %v216_v31 = vpop.f32.mrf.mxu3 }
  0xc1   :  { %v188_v32 = vpop.f32.mrf.mxu0  ;;  %v198_v33 = vpop.f32.mrf.mxu1 }
  0xc2   :  { %v361_v34 = vpack.c.bf16 %v188_v32, %v186_v28  ;;  %v371_v35 = vpack.c.bf16 %v198_v33, %v196_v29 }
  0xc4   :  { %393 = vst [vmem:[#allocation7 + $0x8] sm:$0xff] %v361_v34  }
  0xc5   :  { %395 = vst [vmem:[#allocation7 + $0x18] sm:$0xff] %v371_v35  }
  0xc8   :  { %v208_v36 = vpop.f32.mrf.mxu2  ;;  %v218_v37 = vpop.f32.mrf.mxu3 }
  0xc9   :  { %v381_v38 = vpack.c.bf16 %v208_v36, %v206_v30  ;;  %v391_v39 = vpack.c.bf16 %v218_v37, %v216_v31 }
  0xcb   :  { %397 = vst [vmem:[#allocation7 + $0x28] sm:$0xff] %v381_v38  }
  0xcc   :  { %399 = vst [vmem:[#allocation7 + $0x38] sm:$0xff] %v391_v39  }
  0xcd   :  { %265 = dma.vmem_to_hbm [thread:$0]  %s258_s1, 1024, %s260_s23, [#allocation4], %s508_s17, %s508_s17, %s509_s18  }
  0xce   :  { %505 = dma.done.wait [#allocation4], 1024  }
  0xcf   :  { %506 = vsyncadd [#allocation4], 4294966272 }
  0xd0   :  { %270 = vsyncpa [#allocation3], 1 }
  0xd1   :  { %271 = vsyncpa [#allocation6], 1 }
  0xd2   :  { %272 = vsyncpa [#allocation4], 1 }

</bundles_post_ra>
